<compile_context>
chip_gen: v7x
topology: tpu7x:2x2x1
jax: 0.10.0
libtpu: 0.0.40
codegen_flags: <defaults>
</compile_context>

<pallas_src>
from functools import partial

import jax
import jax.numpy as jnp
from jax.experimental import pallas as pl
from jax.experimental.pallas import tpu as pltpu

_LANE = 128
_VMEM_BUDGET = 48 * 1024 * 1024   # safe on v5e/v6e (128 MiB) and v7x (64 MiB/TC)


def _qtv_vf_kernel(obs_ref, params_ref, out_ref, *, d_obs, horizon):
    """One P-tile of the quadratic time-varying value function.

    obs_ref    : [D*H, TP]   observations; D consecutive [H, TP] slabs, paths on lanes
    params_ref : [H, NP]     per-step coeffs: [ linear (D) | upper-tri quad (D(D+1)/2) | bias ]
    out_ref    : [H, TP]     values, paths on lanes
    """
    D, H = d_obs, horizon
    params = params_ref[...]                                  # small resident tile

    acc = None
    k = D                                                     # first quadratic-coeff column
    for i in range(D):
        obs_i = obs_ref[i * H:(i + 1) * H, :]                 # [H, TP]
        # t = w_lin_i + sum_{j >= i} w_quad_ij * obs_j   (un-halved upper-tri weights)
        t = jnp.broadcast_to(params[:, i:i + 1], obs_i.shape)
        for j in range(i, D):
            obs_j = obs_i if j == i else obs_ref[j * H:(j + 1) * H, :]
            t = t + params[:, k:k + 1] * obs_j
            k += 1
        term = obs_i * t
        acc = term if acc is None else acc + term
    out_ref[...] = acc + params[:, -1:]                       # add bias


@partial(jax.jit, static_argnames=("tile_p",))
def quadratic_time_varying_vf(observations, weights, biases, *, tile_p=8192):
    """observations: [P, H, D], weights: [H, D + D(D+1)/2 + 1], biases: [H] -> [P, H]."""
    P, H, D = observations.shape
    n_quad = D * (D + 1) // 2
    DIN = weights.shape[1]
    assert DIN == D + n_quad + 1

    # ---- parameter packing (tiny, once per call) ------------------------------
    # Trailing feature column (index DIN-1) is identically zero in the module,
    # so its weight is dropped; bias is appended as the last column.
    params = jnp.concatenate(
        [weights[:, :D + n_quad].astype(jnp.float32),
         biases.astype(jnp.float32)[:, None]],
        axis=1)                                                        # [H, D + n_quad + 1]

    # ---- lane-dense observation layout ----------------------------------------
    obs_t = jnp.transpose(observations.astype(jnp.float32), (2, 1, 0))  # [D, H, P]

    # ---- tile size: as large as VMEM allows, >= 2 grid steps when possible ----
    p_lane = ((P + _LANE - 1) // _LANE) * _LANE
    # double-buffered obs + out blocks plus elementwise temporaries, per path
    bytes_per_path = 4 * (2 * D * H + 2 * H + (D + 3) * H)
    max_tp_vmem = max(_LANE, ((_VMEM_BUDGET // 2) // bytes_per_path) // _LANE * _LANE)
    tp = min(int(tile_p), p_lane, max_tp_vmem)
    tp = max(_LANE, (tp // _LANE) * _LANE)
    if p_lane > _LANE and p_lane // tp < 2:
        # keep >= 2 grid steps so the "parallel" axis feeds both v7x TensorCores
        tp = ((p_lane // 2 + _LANE - 1) // _LANE) * _LANE
    p_pad = ((p_lane + tp - 1) // tp) * tp

    if p_pad != P:
        obs_t = jnp.pad(obs_t, ((0, 0), (0, 0), (0, p_pad - P)))
    obs2d = obs_t.reshape(D * H, p_pad)                                # contiguous 2-D slab

    grid = (p_pad // tp,)
    out = pl.pallas_call(
        partial(_qtv_vf_kernel, d_obs=D, horizon=H),
        out_shape=jax.ShapeDtypeStruct((H, p_pad), jnp.float32),
        grid=grid,
        in_specs=[
            pl.BlockSpec((D * H, tp), lambda i: (0, i)),
            pl.BlockSpec((H, D + n_quad + 1), lambda i: (0, 0)),      # resident params tile
        ],
        out_specs=pl.BlockSpec((H, tp), lambda i: (0, i)),
        compiler_params=pltpu.CompilerParams(
            dimension_semantics=("parallel",),
            vmem_limit_bytes=_VMEM_BUDGET,
        ),
    )(obs2d, params)

    return jnp.transpose(out[:, :P], (1, 0))                           # [P, H]


def _reference_forward(observations, weights, biases):
    """Pure-JAX mirror of the PyTorch forward, for verification."""
    P, H, D = observations.shape
    DIN = weights.shape[1]
    feats = [observations]
    for i in range(D):
        for j in range(i, D):
            feats.append((observations[:, :, i] * observations[:, :, j])[..., None])
    feats.append(jnp.zeros((P, H, 1), jnp.float32))                    # trailing zero col
    feat_mat = jnp.concatenate(feats, axis=-1)
    assert feat_mat.shape[-1] == DIN
    return (feat_mat * weights[None]).sum(-1) + biases[None, :]


if __name__ == "__main__":
    # Small shapes consistent with the module: exercises padding (257 -> 384/512),
    # the >=2-grid-step path (default tile), and a 3-step grid (tile_p=128).
    num_paths, horizon, d_obs = 257, 8, 4
    d_input = d_obs + d_obs * (d_obs + 1) // 2 + 1                     # 4 + 10 + 1 = 15

    key = jax.random.PRNGKey(0)
    k_obs, k_w, k_b = jax.random.split(key, 3)
    observations = jax.random.normal(k_obs, (num_paths, horizon, d_obs), jnp.float32)
    # Module __init__ uses zeros; use deterministic non-trivial params instead
    # so the kernel's compute path is actually exercised.
    weights = 0.1 * jax.random.normal(k_w, (horizon, d_input), jnp.float32)
    biases = 0.1 * jax.random.normal(k_b, (horizon,), jnp.float32)

    ref = _reference_forward(observations, weights, biases)

    out = quadratic_time_varying_vf(observations, weights, biases, tile_p=128)
    out = jax.block_until_ready(out)
    assert out.shape == (num_paths, horizon)
    assert jnp.allclose(out, ref, atol=1e-5, rtol=1e-5)

    out2 = quadratic_time_varying_vf(observations, weights, biases)    # default (large) tile
    out2 = jax.block_until_ready(out2)
    assert jnp.allclose(out2, ref, atol=1e-5, rtol=1e-5)

    print("KERNEL_OK")
</pallas_src>

<mosaic_0001>
module attributes {stable_mosaic.version = 11 : i64} {
  func.func @_qtv_vf_kernel(%arg0: i32, %arg1: memref<32x128xf32, #tpu.memory_space<vmem>>, %arg2: memref<8x15xf32, #tpu.memory_space<vmem>>, %arg3: memref<8x128xf32, #tpu.memory_space<vmem>>) attributes {dimension_semantics = [#tpu.dimension_semantics<parallel>], iteration_bounds = array<i64: 3>, scalar_prefetch = 0 : i64, scratch_operands = 0 : i64, tpu.core_type = #tpu.core_type<tc>, window_params = [{transform_indices = @transform_0, window_bounds = array<i64: 32, 128>}, {pipeline_mode = #tpu.pipeline_mode<synchronous>, transform_indices = @transform_1, window_bounds = array<i64: 8, 15>}, {transform_indices = @transform_2, window_bounds = array<i64: 8, 128>}]} {
    %c0 = arith.constant 0 : index
    %c0_0 = arith.constant 0 : index
    %0 = vector.load %arg2[%c0, %c0_0] : memref<8x15xf32, #tpu.memory_space<vmem>>, vector<8x15xf32>
    %c0_1 = arith.constant 0 : index
    %c0_2 = arith.constant 0 : index
    %1 = vector.load %arg1[%c0_1, %c0_2] : memref<32x128xf32, #tpu.memory_space<vmem>>, vector<8x128xf32>
    %2 = vector.extract_strided_slice %0 {offsets = [0, 0], sizes = [8, 1], strides = [1, 1]} : vector<8x15xf32> to vector<8x1xf32>
    %3 = vector.shape_cast %2 : vector<8x1xf32> to vector<8x1xf32>
    %4 = vector.broadcast %3 : vector<8x1xf32> to vector<8x128xf32>
    %5 = vector.extract_strided_slice %0 {offsets = [0, 4], sizes = [8, 1], strides = [1, 1]} : vector<8x15xf32> to vector<8x1xf32>
    %6 = vector.broadcast %5 : vector<8x1xf32> to vector<8x128xf32>
    %7 = arith.mulf %6, %1 : vector<8x128xf32>
    %8 = arith.addf %4, %7 : vector<8x128xf32>
    %c8 = arith.constant 8 : index
    %c0_3 = arith.constant 0 : index
    %9 = vector.load %arg1[%c8, %c0_3] : memref<32x128xf32, #tpu.memory_space<vmem>>, vector<8x128xf32>
    %10 = vector.extract_strided_slice %0 {offsets = [0, 5], sizes = [8, 1], strides = [1, 1]} : vector<8x15xf32> to vector<8x1xf32>
    %11 = vector.broadcast %10 : vector<8x1xf32> to vector<8x128xf32>
    %12 = arith.mulf %11, %9 : vector<8x128xf32>
    %13 = arith.addf %8, %12 : vector<8x128xf32>
    %c16 = arith.constant 16 : index
    %c0_4 = arith.constant 0 : index
    %14 = vector.load %arg1[%c16, %c0_4] : memref<32x128xf32, #tpu.memory_space<vmem>>, vector<8x128xf32>
    %15 = vector.extract_strided_slice %0 {offsets = [0, 6], sizes = [8, 1], strides = [1, 1]} : vector<8x15xf32> to vector<8x1xf32>
    %16 = vector.broadcast %15 : vector<8x1xf32> to vector<8x128xf32>
    %17 = arith.mulf %16, %14 : vector<8x128xf32>
    %18 = arith.addf %13, %17 : vector<8x128xf32>
    %c24 = arith.constant 24 : index
    %c0_5 = arith.constant 0 : index
    %19 = vector.load %arg1[%c24, %c0_5] : memref<32x128xf32, #tpu.memory_space<vmem>>, vector<8x128xf32>
    %20 = vector.extract_strided_slice %0 {offsets = [0, 7], sizes = [8, 1], strides = [1, 1]} : vector<8x15xf32> to vector<8x1xf32>
    %21 = vector.broadcast %20 : vector<8x1xf32> to vector<8x128xf32>
    %22 = arith.mulf %21, %19 : vector<8x128xf32>
    %23 = arith.addf %18, %22 : vector<8x128xf32>
    %24 = arith.mulf %1, %23 : vector<8x128xf32>
    %c8_6 = arith.constant 8 : index
    %c0_7 = arith.constant 0 : index
    %25 = vector.load %arg1[%c8_6, %c0_7] : memref<32x128xf32, #tpu.memory_space<vmem>>, vector<8x128xf32>
    %26 = vector.extract_strided_slice %0 {offsets = [0, 1], sizes = [8, 1], strides = [1, 1]} : vector<8x15xf32> to vector<8x1xf32>
    %27 = vector.shape_cast %26 : vector<8x1xf32> to vector<8x1xf32>
    %28 = vector.broadcast %27 : vector<8x1xf32> to vector<8x128xf32>
    %29 = vector.extract_strided_slice %0 {offsets = [0, 8], sizes = [8, 1], strides = [1, 1]} : vector<8x15xf32> to vector<8x1xf32>
    %30 = vector.broadcast %29 : vector<8x1xf32> to vector<8x128xf32>
    %31 = arith.mulf %30, %25 : vector<8x128xf32>
    %32 = arith.addf %28, %31 : vector<8x128xf32>
    %c16_8 = arith.constant 16 : index
    %c0_9 = arith.constant 0 : index
    %33 = vector.load %arg1[%c16_8, %c0_9] : memref<32x128xf32, #tpu.memory_space<vmem>>, vector<8x128xf32>
    %34 = vector.extract_strided_slice %0 {offsets = [0, 9], sizes = [8, 1], strides = [1, 1]} : vector<8x15xf32> to vector<8x1xf32>
    %35 = vector.broadcast %34 : vector<8x1xf32> to vector<8x128xf32>
    %36 = arith.mulf %35, %33 : vector<8x128xf32>
    %37 = arith.addf %32, %36 : vector<8x128xf32>
    %c24_10 = arith.constant 24 : index
    %c0_11 = arith.constant 0 : index
    %38 = vector.load %arg1[%c24_10, %c0_11] : memref<32x128xf32, #tpu.memory_space<vmem>>, vector<8x128xf32>
    %39 = vector.extract_strided_slice %0 {offsets = [0, 10], sizes = [8, 1], strides = [1, 1]} : vector<8x15xf32> to vector<8x1xf32>
    %40 = vector.broadcast %39 : vector<8x1xf32> to vector<8x128xf32>
    %41 = arith.mulf %40, %38 : vector<8x128xf32>
    %42 = arith.addf %37, %41 : vector<8x128xf32>
    %43 = arith.mulf %25, %42 : vector<8x128xf32>
    %44 = arith.addf %24, %43 : vector<8x128xf32>
    %c16_12 = arith.constant 16 : index
    %c0_13 = arith.constant 0 : index
    %45 = vector.load %arg1[%c16_12, %c0_13] : memref<32x128xf32, #tpu.memory_space<vmem>>, vector<8x128xf32>
    %46 = vector.extract_strided_slice %0 {offsets = [0, 2], sizes = [8, 1], strides = [1, 1]} : vector<8x15xf32> to vector<8x1xf32>
    %47 = vector.shape_cast %46 : vector<8x1xf32> to vector<8x1xf32>
    %48 = vector.broadcast %47 : vector<8x1xf32> to vector<8x128xf32>
    %49 = vector.extract_strided_slice %0 {offsets = [0, 11], sizes = [8, 1], strides = [1, 1]} : vector<8x15xf32> to vector<8x1xf32>
    %50 = vector.broadcast %49 : vector<8x1xf32> to vector<8x128xf32>
    %51 = arith.mulf %50, %45 : vector<8x128xf32>
    %52 = arith.addf %48, %51 : vector<8x128xf32>
    %c24_14 = arith.constant 24 : index
    %c0_15 = arith.constant 0 : index
    %53 = vector.load %arg1[%c24_14, %c0_15] : memref<32x128xf32, #tpu.memory_space<vmem>>, vector<8x128xf32>
    %54 = vector.extract_strided_slice %0 {offsets = [0, 12], sizes = [8, 1], strides = [1, 1]} : vector<8x15xf32> to vector<8x1xf32>
    %55 = vector.broadcast %54 : vector<8x1xf32> to vector<8x128xf32>
    %56 = arith.mulf %55, %53 : vector<8x128xf32>
    %57 = arith.addf %52, %56 : vector<8x128xf32>
    %58 = arith.mulf %45, %57 : vector<8x128xf32>
    %59 = arith.addf %44, %58 : vector<8x128xf32>
    %c24_16 = arith.constant 24 : index
    %c0_17 = arith.constant 0 : index
    %60 = vector.load %arg1[%c24_16, %c0_17] : memref<32x128xf32, #tpu.memory_space<vmem>>, vector<8x128xf32>
    %61 = vector.extract_strided_slice %0 {offsets = [0, 3], sizes = [8, 1], strides = [1, 1]} : vector<8x15xf32> to vector<8x1xf32>
    %62 = vector.shape_cast %61 : vector<8x1xf32> to vector<8x1xf32>
    %63 = vector.broadcast %62 : vector<8x1xf32> to vector<8x128xf32>
    %64 = vector.extract_strided_slice %0 {offsets = [0, 13], sizes = [8, 1], strides = [1, 1]} : vector<8x15xf32> to vector<8x1xf32>
    %65 = vector.broadcast %64 : vector<8x1xf32> to vector<8x128xf32>
    %66 = arith.mulf %65, %60 : vector<8x128xf32>
    %67 = arith.addf %63, %66 : vector<8x128xf32>
    %68 = arith.mulf %60, %67 : vector<8x128xf32>
    %69 = arith.addf %59, %68 : vector<8x128xf32>
    %70 = vector.extract_strided_slice %0 {offsets = [0, 14], sizes = [8, 1], strides = [1, 1]} : vector<8x15xf32> to vector<8x1xf32>
    %71 = vector.broadcast %70 : vector<8x1xf32> to vector<8x128xf32>
    %72 = arith.addf %69, %71 : vector<8x128xf32>
    %c0_18 = arith.constant 0 : index
    %c0_19 = arith.constant 0 : index
    %73 = vector.load %arg3[%c0_18, %c0_19] : memref<8x128xf32, #tpu.memory_space<vmem>>, vector<8x128xf32>
    tpu.vector_store %arg3[%c0_18, %c0_19], %72 {strides = array<i32>} : memref<8x128xf32, #tpu.memory_space<vmem>>, vector<8x128xf32>,
    return
  }
  func.func @transform_0(%arg0: i32) -> (i32, i32) {
    %c0_i32 = arith.constant 0 : i32
    %c0_i32_0 = arith.constant 0 : i32
    return %c0_i32, %arg0 : i32, i32
  }
  func.func @transform_1(%arg0: i32) -> (i32, i32) {
    %c0_i32 = arith.constant 0 : i32
    %c0_i32_0 = arith.constant 0 : i32
    %c0_i32_1 = arith.constant 0 : i32
    return %c0_i32, %c0_i32_0 : i32, i32
  }
  func.func @transform_2(%arg0: i32) -> (i32, i32) {
    %c0_i32 = arith.constant 0 : i32
    %c0_i32_0 = arith.constant 0 : i32
    return %c0_i32, %arg0 : i32, i32
  }
}

</mosaic_0001>

<bundles_post_ra>
// kernel: quadratic_time_varying_vf.1
= control target key start
LH: loop header
LB: loop body
LE: loop exit
PB: predicated region body
PF: predicated region fallthrough
CT: control target
= control target key end

     0   :  { %s461_s9 = smov 0   ;;  %s463_s10 = smov 0   ;;  %s518_s0 = inlined_call_operand.vmem [shape: f32[32,384], index: 0, kind: input, shape index: {}]   ;;  %s519_s1 = inlined_call_operand.vmem [shape: f32[8,15], index: 1, kind: input, shape index: {}]   ;;  %s520_s2 = inlined_call_operand.vmem [shape: f32[8,384], index: 2, kind: output, shape index: {}]  }
   0x1   :  { %s465_s11 = smov 0  }
   0x2 LB: > { %s342_s12 = sadd.s32 4294967295, %s429_s11   ;;  %s478_s13 = sadd.s32 1, %s429_s11   ;;  %s429_s11 = sphi %s465_s11, %s523_s11   ;;  %s425_s10 = sphi %s463_s10, %s522_s10   ;;  %s421_s9 = sphi %s461_s9, %s521_s9  }
   0x3   : > { %s16_s14 = ssub.s32 %s429_s11, %s478_s13  ;;  %s19_s15 = sadd.s32 1, %s425_s10 }
   0x4   : > { %p17_p0 = scmp.eq.s32.totalorder %s16_s14, 0  ;;  %p26_p1 = scmp.ne.s32.totalorder %s425_s10, %s421_s9 }
   0x5   : > { %p27_p2 = scmp.eq.s32.totalorder %s429_s11, 0  ;;  %p345_p4 = scmp.ge.s32.totalorder %s429_s11, 3 }
   0x6   : > { %s487_s16 = scalar_select %p17_p0, %s425_s10, %s19_s15  }
   0x7   : > { %p28_p3 = por %p27_p2, %p26_p1  ;;  %102 = sbr.rel (%p345_p4) target bundleno = 21 (0x15), region = 20 }
   0xe   : > { %105 = sbr.rel (!%p28_p3) target bundleno = 21 (0x15), region = 24  ;;  %s107_s17 = sand.u32 (%p28_p3), 1, %s425_s10  }
   0xf   : > { %s347_s18 = sshll.u32 (%p28_p3), %s429_s11, 3  ;;  %s346_s19 = sshll.u32 (%p28_p3), %s107_s17, 5 }
  0x10   : > { %s111_s22 = scalar_lea.vmem (%p28_p3), %s518_s0, %s347_s18  ;;  %s109_s23 = scalar_lea.vmem (%p28_p3), [#allocation2], %s346_s19 }
  0x11   : > { %v145_v0 = vld [vmem:[%s111_s22] sm:$0xff] (%p28_p3)  ;;  %v147_v1 = vld [vmem:[%s111_s22 + $0x18] sm:$0xff] (%p28_p3)  ;;  %v149_v2 = vld [vmem:[%s111_s22 + $0x30] sm:$0xff] (%p28_p3) }
  0x12   : > { %146 = vst [vmem:[%s109_s23] sm:$0xff] (%p28_p3), %v145_v0  ;;  %148 = vst [vmem:[%s109_s23 + $0x8] sm:$0xff] (%p28_p3), %v147_v1  ;;  %v151_v3 = vld [vmem:[%s111_s22 + $0x48] sm:$0xff] (%p28_p3) }
  0x13   : > { %150 = vst [vmem:[%s109_s23 + $0x10] sm:$0xff] (%p28_p3), %v149_v2  ;;  %152 = vst [vmem:[%s109_s23 + $0x18] sm:$0xff] (%p28_p3), %v151_v3 }
  0x15 PF: > { %p348_p5 = scmp.ge.s32.totalorder %s429_s11, 1  ;;  %p157_p6 = scmp.lt.s32.totalorder %s429_s11, 4 }
  0x17   : > { %p158_p7 = pnand %p348_p5, %p157_p6 }
  0x18   : > { %v188_v4 = vld [vmem:[%s519_s1] sm:$0xff] (!%p158_p7)  ;;  %v431_v5 = vmov (!%p158_p7), 5   ;;  %v432_v6 = vmov (!%p158_p7), 4   ;;  %v433_v7 = vmov (!%p158_p7), 8   ;;  %v434_v8 = vmov (!%p158_p7), 0   ;;  %s164_s26 = sand.u32 (!%p158_p7), 1, %s421_s9  }
  0x19   : > { %161 = sbr.rel (%p158_p7) target bundleno = 203 (0xcb), region = 62  ;;  %394 = vset.pattern.permute.xlu1 (!%p158_p7), %v431_v5  ;;  %392 = vset.pattern.permute.xlu0 (!%p158_p7), %v432_v6  ;;  %v435_v9 = vmov (!%p158_p7), 6   ;;  %v436_v10 = vmov (!%p158_p7), 1   ;;  %v437_v11 = vmov (!%p158_p7), 9   ;;  %v438_v12 = vmov (!%p158_p7), 10   ;;  %s349_s27 = sshll.u32 (!%p158_p7), %s164_s26, 5 }
  0x1a   : > { %203 = vperm.xlu1 (!%p158_p7), %394, %v188_v4   ;;  %196 = vperm.xlu0 (!%p158_p7), %392, %v188_v4   ;;  %v439_v13 = vmov (!%p158_p7), 7   ;;  %v440_v14 = vmov (!%p158_p7), 12   ;;  %v441_v15 = vmov (!%p158_p7), 11   ;;  %v442_v16 = vmov (!%p158_p7), 14   ;;  %s166_s28 = scalar_lea.vmem (!%p158_p7), [#allocation2], %s349_s27  ;;  %p184_p8 = scmp.lt.s32.totalorder (!%p158_p7), %s342_s12, 2 }
  0x1b   : > { %v443_v17 = vmov (!%p158_p7), 2   ;;  %v444_v18 = vmov (!%p158_p7), 13   ;;  %v445_v19 = vmov (!%p158_p7), 3   ;;  %v189_v26 = vld [vmem:[%s166_s28] sm:$0xff] (!%p158_p7)  ;;  %v201_v30 = vld [vmem:[%s166_s28 + $0x8] sm:$0xff] (!%p158_p7)  ;;  %v208_v31 = vld [vmem:[%s166_s28 + $0x10] sm:$0xff] (!%p158_p7) }
  0x1c   : > { %v215_v40 = vld [vmem:[%s166_s28 + $0x18] sm:$0xff] (!%p158_p7) }
  0x1e   : > { %395 = vset.pattern.permute.xlu1 (!%p158_p7), %v433_v7  ;;  %393 = vset.pattern.permute.xlu0 (!%p158_p7), %v434_v8 }
  0x1f   : > { %228 = vperm.xlu1 (!%p158_p7), %395, %v188_v4   ;;  %192 = vperm.xlu0 (!%p158_p7), %393, %v188_v4  }
  0x20   : > { %s525_s12 = smov (!%p184_p8, %s342_s12), 2 }
  0x21   : > { %s350_s29 = sshll.u32 %s525_s12, 3 }
  0x22   : > { %s187_s4 = scalar_lea.vmem %s520_s2, %s350_s29 }
  0x23   : > { %396 = vset.pattern.permute.xlu1 %v435_v9  ;;  %397 = vset.pattern.permute.xlu0 %v436_v10 }
  0x24   : > { %210 = vperm.xlu1 %396, %v188_v4   ;;  %224 = vperm.xlu0 %397, %v188_v4  }
  0x28   : > { %398 = vset.pattern.permute.xlu1 %v437_v11  ;;  %400 = vset.pattern.permute.xlu0 %v438_v12 }
  0x29   : > { %234 = vperm.xlu1 %398, %v188_v4   ;;  %240 = vperm.xlu0 %400, %v188_v4  }
  0x2d   : > { %399 = vset.pattern.permute.xlu1 %v439_v13  ;;  %403 = vset.pattern.permute.xlu0 %v440_v14 }
  0x2e   : > { %217 = vperm.xlu1 %399, %v188_v4   ;;  %258 = vperm.xlu0 %403, %v188_v4  }
  0x32   : > { %401 = vset.pattern.permute.xlu1 %v441_v15  ;;  %406 = vset.pattern.permute.xlu0 %v442_v16 }
  0x33   : > { %252 = vperm.xlu1 %401, %v188_v4   ;;  %278 = vperm.xlu0 %406, %v188_v4  }
  0x37   : > { %402 = vset.pattern.permute.xlu1 %v443_v17 }
  0x38   : > { %248 = vperm.xlu1 %402, %v188_v4  }
  0x3c   : > { %404 = vset.pattern.permute.xlu1 %v444_v18 }
  0x3d   : > { %270 = vperm.xlu1 %404, %v188_v4  }
  0x41   : > { %405 = vset.pattern.permute.xlu1 %v445_v19 }
  0x42   : > { %266 = vperm.xlu1 %405, %v188_v4  }
  0x99   : > { %v204_v20 = vpop.permute.xlu1 %203  ;;  %v197_v22 = vpop.permute.xlu0 %196 }
  0x9a   : > { %v199_v27 = vmul.f32 %v197_v22, %v189_v26  ;;  %v206_v35 = vmul.f32 %v204_v20, %v201_v30 }
  0x9e   : > { %v229_v21 = vpop.permute.xlu1 %228  ;;  %v193_v24 = vpop.permute.xlu0 %192 }
  0x9f   : > { %v200_v32 = vadd.f32 %v199_v27, %v193_v24  ;;  %v231_v37 = vmul.f32 %v229_v21, %v201_v30 }
  0xa1   : > { %v207_v39 = vadd.f32 %v206_v35, %v200_v32 }
  0xa3   : > { %v211_v23 = vpop.permute.xlu1 %210  ;;  %v225_v28 = vpop.permute.xlu0 %224 }
  0xa4   : > { %v213_v36 = vmul.f32 %v211_v23, %v208_v31  ;;  %v232_v42 = vadd.f32 %v231_v37, %v225_v28 }
  0xa6   : > { %v214_v45 = vadd.f32 %v213_v36, %v207_v39 }
  0xa8   : > { %v235_v25 = vpop.permute.xlu1 %234  ;;  %v241_v33 = vpop.permute.xlu0 %240 }
  0xa9   : > { %v237_v38 = vmul.f32 %v235_v25, %v208_v31  ;;  %v243_v48 = vmul.f32 %v241_v33, %v215_v40 }
  0xab   : > { %v238_v47 = vadd.f32 %v237_v38, %v232_v42 }
  0xad   : > { %v218_v29 = vpop.permute.xlu1 %217  ;;  %v259_v41 = vpop.permute.xlu0 %258  ;;  %v244_v52 = vadd.f32 %v243_v48, %v238_v47 }
  0xae   : > { %v220_v43 = vmul.f32 %v218_v29, %v215_v40  ;;  %v261_v50 = vmul.f32 %v259_v41, %v215_v40 }
  0xaf   : > { %v245_v56 = vmul.f32 %v244_v52, %v201_v30 }
  0xb0   : > { %v221_v51 = vadd.f32 %v220_v43, %v214_v45 }
  0xb2   : > { %v253_v34 = vpop.permute.xlu1 %252  ;;  %v222_v55 = vmul.f32 %v221_v51, %v189_v26  ;;  %v279_v0 = vpop.permute.xlu0 %278 }
  0xb3   : > { %v255_v44 = vmul.f32 %v253_v34, %v208_v31 }
  0xb4   : > { %v246_v61 = vadd.f32 %v245_v56, %v222_v55 }
  0xb7   : > { %v249_v46 = vpop.permute.xlu1 %248 }
  0xb8   : > { %v256_v49 = vadd.f32 %v255_v44, %v249_v46 }
  0xba   : > { %v262_v53 = vadd.f32 %v261_v50, %v256_v49 }
  0xbc   : > { %v271_v54 = vpop.permute.xlu1 %270  ;;  %v263_v57 = vmul.f32 %v262_v53, %v208_v31 }
  0xbd   : > { %v273_v58 = vmul.f32 %v271_v54, %v215_v40 }
  0xbe   : > { %v264_v63 = vadd.f32 %v263_v57, %v246_v61 }
  0xc1   : > { %v267_v59 = vpop.permute.xlu1 %266 }
  0xc2   : > { %v274_v60 = vadd.f32 %v273_v58, %v267_v59 }
  0xc4   : > { %v275_v62 = vmul.f32 %v274_v60, %v215_v40 }
  0xc6   : > { %v276_v1 = vadd.f32 %v275_v62, %v264_v63 }
  0xc8   : > { %v281_v2 = vadd.f32 %v279_v0, %v276_v1 }
  0xca   : > { %282 = vst [vmem:[%s187_s4] sm:$0xff] %v281_v2 }
  0xcb PF: > { %p9_p9 = scmp.ge.s32.totalorder %s478_s13, 5   ;;  %s521_s9 = smov %s425_s10 }
  0xcc   : > { %s522_s10 = smov %s487_s16  ;;  %s523_s11 = smov %s478_s13 }
  0xcd   :  { %11 = sbr.rel (!%p9_p9) target bundleno = 2 (0x2), region = 101 }

</bundles_post_ra>
